<compile_context>
chip_gen: v7x
topology: tpu7x:2x2x1
jax: 0.10.0
libtpu: 0.0.40
codegen_flags: <defaults>
</compile_context>

<pallas_src>
import functools
import random
from math import pi, sin, cos

import numpy as np
import jax
import jax.numpy as jnp
from jax.experimental import pallas as pl
from jax.experimental.pallas import tpu as pltpu


_LANES = 128
_POSE_D = 9
_PERIOD = _POSE_D * _LANES  # 1152 = lcm(9, 128): one full period of the repeated row


def _broadcast_row_kernel(pat_ref, out_ref):
    """pat_ref (VMEM, [1, W])  : precomputed pattern, already in output dtype.
       out_ref (VMEM, [TR, W]) : pattern broadcast across sublanes (lane-dense store)."""
    out_ref[...] = jnp.broadcast_to(pat_ref[...], out_ref.shape)


def _pick_row_tile(rows):
    # Candidates >= 32 keep the sublane (second-to-last) block dim a multiple of
    # the packing factor for bf16 (16) and int8/fp8 (32) as well as f32 (8).
    for cand in (1024, 512, 256, 128, 64, 32):
        if rows % cand == 0:
            return cand
    return rows  # ragged slab: single full-extent block


@functools.partial(jax.jit, static_argnames=("batch",))
def _pose_xfrm_lane_dense(pattern, batch):
    """pattern: (1, 1152) = the 9-wide row tiled 128x, in the output dtype.
    Produces the output as a lane-dense [batch//128, 1152] slab, then reshapes
    (row-major, free) back to (batch, 9)."""
    rows = (batch * _POSE_D) // _PERIOD            # == batch // 128
    tr = _pick_row_tile(rows)
    n_steps = rows // tr
    flat = pl.pallas_call(
        _broadcast_row_kernel,
        out_shape=jax.ShapeDtypeStruct((rows, _PERIOD), pattern.dtype),
        grid=(n_steps,),
        in_specs=[pl.BlockSpec((1, _PERIOD), lambda i: (0, 0))],   # constant block: no per-step rebuild
        out_specs=pl.BlockSpec((tr, _PERIOD), lambda i: (i, 0)),
        compiler_params=pltpu.CompilerParams(
            dimension_semantics=("parallel",) if n_steps > 1 else ("arbitrary",)),
    )(pattern)
    return flat.reshape(batch, _POSE_D)


@functools.partial(jax.jit, static_argnames=("batch", "dim"))
def _pose_xfrm_small(row, batch, dim):
    """Fallback for ragged/small batches or dim != 9: one full-extent block."""
    return pl.pallas_call(
        _broadcast_row_kernel,
        out_shape=jax.ShapeDtypeStruct((batch, dim), row.dtype),
        grid=(1,),
        in_specs=[pl.BlockSpec((1, dim), lambda i: (0, 0))],
        out_specs=pl.BlockSpec((batch, dim), lambda i: (0, 0)),
    )(row)


class PoseTransformSampler:
    """JAX/Pallas port of the PyTorch PoseTransformSampler."""

    def __init__(self, pos_var=0.5, orient_var=pi / 15,
                 pos_mode='XYZ', orient_mode='XYZ', seed=0):
        self.pos_var = pos_var
        self.orient_var = orient_var
        self.pos_mode = pos_mode
        self.orient_mode = orient_mode
        self._py_rng = random.Random(seed)
        self._np_rng = np.random.default_rng(seed)
        self._last_row = None  # kept for testing / introspection only

    def _beta_sample(self):
        # Beta(0.2, 0.2) — same distribution as torch.distributions.Beta(0.2, 0.2),
        # drawn host-side to avoid a device round-trip per sample.
        return float(self._np_rng.beta(0.2, 0.2))

    def _build_row(self, dim, mode):
        # zeros_like init, identity fill, then per-axis random entries,
        # mirroring the PyTorch branch structure exactly.
        row = np.zeros(dim, dtype=np.float64)
        row[4] = row[6] = row[8] = 1.0
        if mode == 'R':
            if 'X' in self.orient_mode:
                x_euler = self.orient_var * (self._beta_sample() - 0.5)
                row[3] = sin(x_euler)
                row[4] = cos(x_euler)
            if 'Z' in self.orient_mode:
                z_euler = self.orient_var * self._py_rng.sample([-1.0, 1.0], 1)[0]
                row[7] = sin(z_euler)
                row[8] = cos(z_euler)
            if 'Y' in self.orient_mode:
                y_euler = self.orient_var * self._py_rng.sample([-1.0, 1.0], 1)[0]
                row[5] = sin(y_euler)
                row[6] = cos(y_euler)
        else:
            if 'X' in self.pos_mode:
                row[0] = self.pos_var * self._py_rng.sample([-1.0, 1.0], 1)[0]
            if 'Y' in self.pos_mode:
                row[1] = self.pos_var * (self._beta_sample() - 0.5)
            if 'Z' in self.pos_mode:
                row[2] = self.pos_var * (self._beta_sample() - 0.5)
        return row

    def sample_xfrm(self, v):
        B, D = v.shape
        assert D >= 9, "pose vector must have at least 9 components"

        sample_space = ''
        if self.pos_mode:
            sample_space += 'T'
        if self.orient_mode:
            sample_space += 'R'
        mode = self._py_rng.sample(sample_space, 1)[0]

        out_dtype = np.dtype(v.dtype)
        row = self._build_row(D, mode).astype(out_dtype)   # cast once, host-side
        self._last_row = row

        if D == _POSE_D and B % _LANES == 0 and B >= _LANES:
            # Lane-dense path: one full period of the repeated row, dtype-final.
            pattern = jnp.asarray(np.tile(row, _LANES).reshape(1, _PERIOD))
            xfrm = _pose_xfrm_lane_dense(pattern, batch=B)
        else:
            xfrm = _pose_xfrm_small(jnp.asarray(row.reshape(1, D)), batch=B, dim=D)
        return xfrm, mode

    def __call__(self, v):
        return self.sample_xfrm(v)


def _check_output(x, mode, row, pos_var):
    assert np.isfinite(x).all()                      # no NaN propagation from v
    assert (np.abs(x - x[0:1]) < 1e-6).all()         # every row identical
    assert np.allclose(x[0], row, atol=1e-6)         # matches the host-built row
    if mode == 'T':
        assert np.allclose(x[0, [4, 6, 8]], 1.0, atol=1e-6)
        assert np.allclose(x[0, [3, 5, 7]], 0.0, atol=1e-6)
        assert abs(abs(x[0, 0]) - pos_var) < 1e-6
        assert abs(x[0, 1]) <= pos_var / 2 + 1e-6
        assert abs(x[0, 2]) <= pos_var / 2 + 1e-6
    else:
        for s, c in ((3, 4), (5, 6), (7, 8)):
            assert abs(x[0, s] ** 2 + x[0, c] ** 2 - 1.0) < 1e-5
        assert np.allclose(x[0, 0:3], 0.0, atol=1e-6)


if __name__ == "__main__":
    key = jax.random.PRNGKey(0)
    sampler = PoseTransformSampler(seed=0)

    # --- small / ragged batch: fallback single-block path ---
    B, D = 8, 9
    v = jax.random.normal(key, (B, D), dtype=jnp.float32)
    v = v.at[0, 0].set(jnp.nan)          # v values are unused -> must not propagate
    xfrm, mode = sampler(v)
    xfrm = jax.block_until_ready(xfrm)
    x = np.asarray(jax.device_get(xfrm))
    assert x.shape == (B, D) and x.dtype == np.float32
    _check_output(x, mode, sampler._last_row, sampler.pos_var)

    # --- lane-dense path (B % 128 == 0): (B//128, 1152) slab, unmasked stores ---
    B2 = 256
    v2 = jax.random.normal(jax.random.PRNGKey(1), (B2, D), dtype=jnp.float32)
    xfrm2, mode2 = sampler(v2)
    xfrm2 = jax.block_until_ready(xfrm2)
    x2 = np.asarray(jax.device_get(xfrm2))
    assert x2.shape == (B2, D) and x2.dtype == np.float32
    _check_output(x2, mode2, sampler._last_row, sampler.pos_var)

    print("KERNEL_OK")
</pallas_src>

<mosaic_0001>
module attributes {stable_mosaic.version = 11 : i64} {
  func.func @_broadcast_row_kernel(%arg0: i32, %arg1: memref<1x9xf32, #tpu.memory_space<vmem>>, %arg2: memref<8x9xf32, #tpu.memory_space<vmem>>) attributes {dimension_semantics = [#tpu.dimension_semantics<arbitrary>], iteration_bounds = array<i64: 1>, scalar_prefetch = 0 : i64, scratch_operands = 0 : i64, tpu.core_type = #tpu.core_type<tc>, window_params = [{pipeline_mode = #tpu.pipeline_mode<synchronous>, transform_indices = @transform_0, window_bounds = array<i64: 1, 9>}, {pipeline_mode = #tpu.pipeline_mode<synchronous>, transform_indices = @transform_1, window_bounds = array<i64: 8, 9>}]} {
    %c0 = arith.constant 0 : index
    %c0_0 = arith.constant 0 : index
    %0 = vector.load %arg1[%c0, %c0_0] : memref<1x9xf32, #tpu.memory_space<vmem>>, vector<1x9xf32>
    %1 = vector.shape_cast %0 : vector<1x9xf32> to vector<1x9xf32>
    %2 = vector.broadcast %1 : vector<1x9xf32> to vector<8x9xf32>
    %c0_1 = arith.constant 0 : index
    %c0_2 = arith.constant 0 : index
    %3 = vector.load %arg2[%c0_1, %c0_2] : memref<8x9xf32, #tpu.memory_space<vmem>>, vector<8x9xf32>
    tpu.vector_store %arg2[%c0_1, %c0_2], %2 {strides = array<i32>} : memref<8x9xf32, #tpu.memory_space<vmem>>, vector<8x9xf32>,
    return
  }
  func.func @transform_0(%arg0: i32) -> (i32, i32) {
    %c0_i32 = arith.constant 0 : i32
    %c0_i32_0 = arith.constant 0 : i32
    %c0_i32_1 = arith.constant 0 : i32
    return %c0_i32, %c0_i32_0 : i32, i32
  }
  func.func @transform_1(%arg0: i32) -> (i32, i32) {
    %c0_i32 = arith.constant 0 : i32
    %c0_i32_0 = arith.constant 0 : i32
    %c0_i32_1 = arith.constant 0 : i32
    return %c0_i32, %c0_i32_0 : i32, i32
  }
}

</mosaic_0001>

<bundles_post_ra>
// kernel: _pose_xfrm_small.1
= control target key start
LH: loop header
LB: loop body
LE: loop exit
PB: predicated region body
PF: predicated region fallthrough
CT: control target
= control target key end

     0   :  { %6 = vsyncpa [#allocation3], 0  ;;  %s132_s0 = inlined_call_operand.hbm [shape: f32[1,9], index: 0, kind: input, shape index: {}]   ;;  %s133_s1 = inlined_call_operand.hbm [shape: f32[8,9], index: 1, kind: output, shape index: {}]  }
   0x1   :  { %7 = vsyncpa [#allocation4], 0  ;;  %s96_s6 = smov [#allocation2]   ;;  %s48_s10 = scalar_lea.hbm %s132_s0, 16 }
   0x2   :  { %s14_s7 = sshll.u32 %s96_s6, 4  ;;  %p49_p0 = scmp.ne.s32.totalorder %s132_s0, %s48_s10  ;;  %s15_s7 = int_to_ptr.vmem [resolvable:$true] %s14_s7 }
   0x3   :  { %p52_p1 = scmp.lt.u32.totalorder %s48_s10, %s132_s0 }
   0x5   :  { %p54_p2 = pnand %p52_p1, %p49_p0 }
   0x7   :  { %57 = shalt.err (!%p54_p2)
}
   0x8   :  { %s58_s15 = scalar_lea.vmem %s15_s7, 16  ;;  %s62_s16 = scalar_lea.vmem %s15_s7, 32 }
   0x9   :  { %p59_p3 = scmp.ne.s32.totalorder %s15_s7, %s58_s15  ;;  %p63_p4 = scmp.lt.s32.totalorder %s15_s7, %s15_s7 }
   0xa   :  { %p64_p5 = scmp.lt.s32.totalorder %s62_s16, %s58_s15 }
   0xc   :  { %p65_p6 = por %p64_p5, %p63_p4 }
   0xe   :  { %p66_p7 = pnand %p65_p6, %p59_p3 }
  0x10   :  { %69 = shalt.err (!%p66_p7)
}
  0x11   :  { %17 = dma.hbm_to_vmem [thread:$0]  %s132_s0, 16, %s15_s7, [#allocation3]  }
  0x12   :  { %92 = dma.done.wait [#allocation3], 16  }
  0x13   :  { %93 = vsyncadd [#allocation3], 4294967280  ;;  %s97_s19 = smov [#allocation5]   ;;  %vm28_vm0 = vcmask 72704   ;;  %v45_v0 = vld [vmem:[#allocation2] ss:$0 sm:$0xff] }
  0x14   :  { %s36_s20 = sshll.u32 %s97_s19, 4  ;;  %29 = vst.msk [vmem:[#allocation5] sm:$0xff] %vm28_vm0, %v45_v0  ;;  %s37_s20 = int_to_ptr.vmem [resolvable:$true] %s36_s20 }
  0x15   :  { %s70_s21 = scalar_lea.vmem %s37_s20, 128  ;;  %p75_p9 = scmp.lt.s32.totalorder %s37_s20, %s37_s20 }
  0x16   :  { %p71_p8 = scmp.ne.s32.totalorder %s37_s20, %s70_s21  ;;  %p76_p10 = scmp.lt.s32.totalorder %s70_s21, %s70_s21 }
  0x18   :  { %p77_p11 = por %p76_p10, %p75_p9 }
  0x1a   :  { %p78_p12 = pnand %p77_p11, %p71_p8 }
  0x1c   :  { %81 = shalt.err (!%p78_p12)
}
  0x1d   :  { %s82_s24 = scalar_lea.hbm %s133_s1, 128 }
  0x1e   :  { %p83_p13 = scmp.ne.s32.totalorder %s133_s1, %s82_s24  ;;  %p86_p0 = scmp.lt.u32.totalorder %s82_s24, %s133_s1 }
  0x20   :  { %p88_p1 = pnand %p86_p0, %p83_p13 }
  0x22   :  { %91 = shalt.err (!%p88_p1)
}
  0x23   :  { %39 = dma.vmem_to_hbm [thread:$0]  %s37_s20, 128, %s133_s1, [#allocation4]  }
  0x24   :  { %94 = dma.done.wait [#allocation4], 128  }
  0x25   :  { %95 = vsyncadd [#allocation4], 4294967168 }
  0x26   :  { %43 = vsyncpa [#allocation3], 1 }
  0x27   :  { %44 = vsyncpa [#allocation4], 1 }

</bundles_post_ra>
